<compile_context>
chip_gen: v7x
topology: tpu7x:2x2x1
jax: 0.10.0
libtpu: 0.0.40
codegen_flags: <defaults>
</compile_context>

<pallas_src>
import functools

import jax
import jax.numpy as jnp
from jax.experimental import pallas as pl
from jax.experimental.pallas import tpu as pltpu

_HIDDEN = 100          # logical hidden width (matches the PyTorch module)
_HPAD = 128            # padded hidden width (multiple of the 128-lane vreg width)


def _round_up(n, m):
    return ((n + m - 1) // m) * m


def _autodecoder_kernel(x_ref, w0_ref, b0_ref, w1_ref, b1_ref, w2_ref, b2_ref, o_ref):
    # One batch tile per grid step; all weights are VMEM-resident (constant block index).
    x = x_ref[...]

    # dec0: (TB, Ppad) @ (Ppad, 128) + (1, 128), ReLU  (padded lanes are exact zeros)
    h0 = jnp.dot(x, w0_ref[...], preferred_element_type=jnp.float32) + b0_ref[...]
    h0 = jnp.maximum(h0, 0.0)

    # dec1: (TB, 128) @ (128, 128) + (1, 128), ReLU
    h1 = jnp.dot(h0, w1_ref[...], preferred_element_type=jnp.float32) + b1_ref[...]
    h1 = jnp.maximum(h1, 0.0)

    # dec2: (TB, 128) @ (128, Dpad) + (1, Dpad)   (no activation; pad sliced off in wrapper)
    out = jnp.dot(h1, w2_ref[...], preferred_element_type=jnp.float32) + b2_ref[...]
    o_ref[...] = out.astype(o_ref.dtype)


@functools.partial(jax.jit, static_argnames=("block_b",))
def auto_decoder_forward(x, params, *, block_b=512):
    """x: (B, param_dim) float32; params: dict of (in,out) weights and (1,out) biases."""
    w0, b0, w1, b1, w2, b2 = (
        params["w0"], params["b0"], params["w1"], params["b1"], params["w2"], params["b2"]
    )
    B, P = x.shape
    H = w0.shape[1]
    D = w2.shape[1]

    # ---- pad everything to (8, 128)-friendly shapes (zeros are numerically inert here) ----
    Ppad = _round_up(P, 128)
    Hpad = _round_up(H, 128)
    Dpad = _round_up(D, 128)
    TB = min(block_b, _round_up(B, 8))          # batch tile (sublane-aligned)
    Bpad = _round_up(B, TB)

    xp = jnp.pad(x, ((0, Bpad - B), (0, Ppad - P)))
    w0p = jnp.pad(w0, ((0, Ppad - P), (0, Hpad - H)))
    b0p = jnp.pad(b0, ((0, 0), (0, Hpad - H)))
    w1p = jnp.pad(w1, ((0, Hpad - H), (0, Hpad - H)))
    b1p = jnp.pad(b1, ((0, 0), (0, Hpad - H)))
    w2p = jnp.pad(w2, ((0, Hpad - H), (0, Dpad - D)))
    b2p = jnp.pad(b2, ((0, 0), (0, Dpad - D)))

    grid = (Bpad // TB,)

    # weights / biases: constant block index -> fetched once, stay resident across batch tiles
    const = lambda shape: pl.BlockSpec(shape, lambda i: (0, 0))

    flops = 2 * Bpad * (Ppad * Hpad + Hpad * Hpad + Hpad * Dpad)
    bytes_accessed = 4 * (
        Bpad * Ppad + Bpad * Dpad
        + Ppad * Hpad + Hpad + Hpad * Hpad + Hpad + Hpad * Dpad + Dpad
    )

    out_padded = pl.pallas_call(
        _autodecoder_kernel,
        out_shape=jax.ShapeDtypeStruct((Bpad, Dpad), x.dtype),
        grid=grid,
        in_specs=[
            pl.BlockSpec((TB, Ppad), lambda i: (i, 0)),   # x: tiled over batch
            const((Ppad, Hpad)), const((1, Hpad)),
            const((Hpad, Hpad)), const((1, Hpad)),
            const((Hpad, Dpad)), const((1, Dpad)),
        ],
        out_specs=pl.BlockSpec((TB, Dpad), lambda i: (i, 0)),
        compiler_params=pltpu.CompilerParams(
            dimension_semantics=("parallel",),            # lets v7x split batch across 2 TCs
        ),
        cost_estimate=pl.CostEstimate(
            flops=flops, transcendentals=0, bytes_accessed=bytes_accessed
        ),
    )(xp, w0p, b0p, w1p, b1p, w2p, b2p)

    return out_padded[:B, :D]


def init_params(key, input_dim, param_dim, hidden=_HIDDEN):
    """Deterministic init mimicking PyTorch nn.Linear default (U(-1/sqrt(fan_in), 1/sqrt(fan_in)))."""
    def linear(k, fan_in, fan_out):
        kw, kb = jax.random.split(k)
        bound = 1.0 / jnp.sqrt(jnp.float32(fan_in))
        # stored as (in, out) so the kernel does x @ W
        w = jax.random.uniform(kw, (fan_in, fan_out), jnp.float32, -bound, bound)
        b = jax.random.uniform(kb, (1, fan_out), jnp.float32, -bound, bound)
        return w, b

    k0, k1, k2 = jax.random.split(key, 3)
    w0, b0 = linear(k0, param_dim, hidden)
    w1, b1 = linear(k1, hidden, hidden)
    w2, b2 = linear(k2, hidden, input_dim)
    return {"w0": w0, "b0": b0, "w1": w1, "b1": b1, "w2": w2, "b2": b2}


def reference_forward(x, p):
    h0 = jnp.maximum(x @ p["w0"] + p["b0"], 0.0)
    h1 = jnp.maximum(h0 @ p["w1"] + p["b1"], 0.0)
    return h1 @ p["w2"] + p["b2"]


if __name__ == "__main__":
    batch = 8
    param_dim = 16   # decoder latent / parameter dimension (input to dec0)
    input_dim = 32   # reconstructed signal dimension (output of dec2)

    key = jax.random.PRNGKey(0)
    kx, kp = jax.random.split(key)
    x = jax.random.normal(kx, (batch, param_dim), jnp.float32)
    params = init_params(kp, input_dim, param_dim)

    out = auto_decoder_forward(x, params)
    jax.block_until_ready(out)

    ref = reference_forward(x, params)
    assert out.shape == (batch, input_dim)
    assert jnp.allclose(out, ref, atol=1e-4, rtol=1e-4)

    print("KERNEL_OK")
</pallas_src>

<mosaic_0001>
module attributes {stable_mosaic.version = 11 : i64} {
  func.func @_autodecoder_kernel(%arg0: i32, %arg1: memref<8x128xf32, #tpu.memory_space<vmem>>, %arg2: memref<128x128xf32, #tpu.memory_space<vmem>>, %arg3: memref<1x128xf32, #tpu.memory_space<vmem>>, %arg4: memref<128x128xf32, #tpu.memory_space<vmem>>, %arg5: memref<1x128xf32, #tpu.memory_space<vmem>>, %arg6: memref<128x128xf32, #tpu.memory_space<vmem>>, %arg7: memref<1x128xf32, #tpu.memory_space<vmem>>, %arg8: memref<8x128xf32, #tpu.memory_space<vmem>>) attributes {dimension_semantics = [#tpu.dimension_semantics<parallel>], iteration_bounds = array<i64: 1>, scalar_prefetch = 0 : i64, scratch_operands = 0 : i64, tpu.core_type = #tpu.core_type<tc>, window_params = [{transform_indices = @transform_0, window_bounds = array<i64: 8, 128>}, {pipeline_mode = #tpu.pipeline_mode<synchronous>, transform_indices = @transform_1, window_bounds = array<i64: 128, 128>}, {pipeline_mode = #tpu.pipeline_mode<synchronous>, transform_indices = @transform_2, window_bounds = array<i64: 1, 128>}, {pipeline_mode = #tpu.pipeline_mode<synchronous>, transform_indices = @transform_3, window_bounds = array<i64: 128, 128>}, {pipeline_mode = #tpu.pipeline_mode<synchronous>, transform_indices = @transform_4, window_bounds = array<i64: 1, 128>}, {pipeline_mode = #tpu.pipeline_mode<synchronous>, transform_indices = @transform_5, window_bounds = array<i64: 128, 128>}, {pipeline_mode = #tpu.pipeline_mode<synchronous>, transform_indices = @transform_6, window_bounds = array<i64: 1, 128>}, {transform_indices = @transform_7, window_bounds = array<i64: 8, 128>}]} {
    %c0 = arith.constant 0 : index
    %c0_0 = arith.constant 0 : index
    %0 = vector.load %arg1[%c0, %c0_0] : memref<8x128xf32, #tpu.memory_space<vmem>>, vector<8x128xf32>
    %c0_1 = arith.constant 0 : index
    %c0_2 = arith.constant 0 : index
    %1 = vector.load %arg2[%c0_1, %c0_2] : memref<128x128xf32, #tpu.memory_space<vmem>>, vector<128x128xf32>
    %cst = arith.constant dense<0.000000e+00> : vector<8x128xf32>
    %2 = tpu.matmul %0, %1, %cst {dimension_numbers = #tpu.dot_dimension_numbers<[1], [0], [0], [1], [0, 0, 1, 1], [], []>} : vector<8x128xf32>, vector<128x128xf32>, vector<8x128xf32> -> vector<8x128xf32>
    %c0_3 = arith.constant 0 : index
    %c0_4 = arith.constant 0 : index
    %3 = vector.load %arg3[%c0_3, %c0_4] : memref<1x128xf32, #tpu.memory_space<vmem>>, vector<1x128xf32>
    %4 = vector.broadcast %3 : vector<1x128xf32> to vector<8x128xf32>
    %5 = arith.addf %2, %4 : vector<8x128xf32>
    %cst_5 = arith.constant 0.000000e+00 : f32
    %6 = vector.broadcast %cst_5 : f32 to vector<8x128xf32>
    %7 = arith.maximumf %5, %6 : vector<8x128xf32>
    %c0_6 = arith.constant 0 : index
    %c0_7 = arith.constant 0 : index
    %8 = vector.load %arg4[%c0_6, %c0_7] : memref<128x128xf32, #tpu.memory_space<vmem>>, vector<128x128xf32>
    %cst_8 = arith.constant dense<0.000000e+00> : vector<8x128xf32>
    %9 = tpu.matmul %7, %8, %cst_8 {dimension_numbers = #tpu.dot_dimension_numbers<[1], [0], [0], [1], [0, 0, 1, 1], [], []>} : vector<8x128xf32>, vector<128x128xf32>, vector<8x128xf32> -> vector<8x128xf32>
    %c0_9 = arith.constant 0 : index
    %c0_10 = arith.constant 0 : index
    %10 = vector.load %arg5[%c0_9, %c0_10] : memref<1x128xf32, #tpu.memory_space<vmem>>, vector<1x128xf32>
    %11 = vector.broadcast %10 : vector<1x128xf32> to vector<8x128xf32>
    %12 = arith.addf %9, %11 : vector<8x128xf32>
    %cst_11 = arith.constant 0.000000e+00 : f32
    %13 = vector.broadcast %cst_11 : f32 to vector<8x128xf32>
    %14 = arith.maximumf %12, %13 : vector<8x128xf32>
    %c0_12 = arith.constant 0 : index
    %c0_13 = arith.constant 0 : index
    %15 = vector.load %arg6[%c0_12, %c0_13] : memref<128x128xf32, #tpu.memory_space<vmem>>, vector<128x128xf32>
    %cst_14 = arith.constant dense<0.000000e+00> : vector<8x128xf32>
    %16 = tpu.matmul %14, %15, %cst_14 {dimension_numbers = #tpu.dot_dimension_numbers<[1], [0], [0], [1], [0, 0, 1, 1], [], []>} : vector<8x128xf32>, vector<128x128xf32>, vector<8x128xf32> -> vector<8x128xf32>
    %c0_15 = arith.constant 0 : index
    %c0_16 = arith.constant 0 : index
    %17 = vector.load %arg7[%c0_15, %c0_16] : memref<1x128xf32, #tpu.memory_space<vmem>>, vector<1x128xf32>
    %18 = vector.broadcast %17 : vector<1x128xf32> to vector<8x128xf32>
    %19 = arith.addf %16, %18 : vector<8x128xf32>
    %c0_17 = arith.constant 0 : index
    %c0_18 = arith.constant 0 : index
    %20 = vector.load %arg8[%c0_17, %c0_18] : memref<8x128xf32, #tpu.memory_space<vmem>>, vector<8x128xf32>
    tpu.vector_store %arg8[%c0_17, %c0_18], %19 {strides = array<i32>} : memref<8x128xf32, #tpu.memory_space<vmem>>, vector<8x128xf32>,
    return
  }
  func.func @transform_0(%arg0: i32) -> (i32, i32) {
    %c0_i32 = arith.constant 0 : i32
    %c0_i32_0 = arith.constant 0 : i32
    return %arg0, %c0_i32 : i32, i32
  }
  func.func @transform_1(%arg0: i32) -> (i32, i32) {
    %c0_i32 = arith.constant 0 : i32
    %c0_i32_0 = arith.constant 0 : i32
    %c0_i32_1 = arith.constant 0 : i32
    return %c0_i32, %c0_i32_0 : i32, i32
  }
  func.func @transform_2(%arg0: i32) -> (i32, i32) {
    %c0_i32 = arith.constant 0 : i32
    %c0_i32_0 = arith.constant 0 : i32
    %c0_i32_1 = arith.constant 0 : i32
    return %c0_i32, %c0_i32_0 : i32, i32
  }
  func.func @transform_3(%arg0: i32) -> (i32, i32) {
    %c0_i32 = arith.constant 0 : i32
    %c0_i32_0 = arith.constant 0 : i32
    %c0_i32_1 = arith.constant 0 : i32
    return %c0_i32, %c0_i32_0 : i32, i32
  }
  func.func @transform_4(%arg0: i32) -> (i32, i32) {
    %c0_i32 = arith.constant 0 : i32
    %c0_i32_0 = arith.constant 0 : i32
    %c0_i32_1 = arith.constant 0 : i32
    return %c0_i32, %c0_i32_0 : i32, i32
  }
  func.func @transform_5(%arg0: i32) -> (i32, i32) {
    %c0_i32 = arith.constant 0 : i32
    %c0_i32_0 = arith.constant 0 : i32
    %c0_i32_1 = arith.constant 0 : i32
    return %c0_i32, %c0_i32_0 : i32, i32
  }
  func.func @transform_6(%arg0: i32) -> (i32, i32) {
    %c0_i32 = arith.constant 0 : i32
    %c0_i32_0 = arith.constant 0 : i32
    %c0_i32_1 = arith.constant 0 : i32
    return %c0_i32, %c0_i32_0 : i32, i32
  }
  func.func @transform_7(%arg0: i32) -> (i32, i32) {
    %c0_i32 = arith.constant 0 : i32
    %c0_i32_0 = arith.constant 0 : i32
    return %arg0, %c0_i32 : i32, i32
  }
}

</mosaic_0001>

<bundles_post_ra>
// kernel: auto_decoder_forward.1
= control target key start
LH: loop header
LB: loop body
LE: loop exit
PB: predicated region body
PF: predicated region fallthrough
CT: control target
= control target key end

     0   :  { %v583_v3 = vmov 0.0|0.0   ;;  %vm584_vm0 = vmmov 0   ;;  %v585_v6 = vmov 0.0   ;;  %s825_s0 = inlined_call_operand.vmem [shape: f32[8,128], index: 0, kind: input, shape index: {}]   ;;  %s826_s1 = inlined_call_operand.vmem [shape: f32[128,128], index: 1, kind: input, shape index: {}]   ;;  %s827_s2 = inlined_call_operand.vmem [shape: f32[1,128], index: 2, kind: input, shape index: {}]   ;;  %s828_s3 = inlined_call_operand.vmem [shape: f32[128,128], index: 3, kind: input, shape index: {}]   ;;  %s829_s4 = inlined_call_operand.vmem [shape: f32[1,128], index: 4, kind: input, shape index: {}]   ;;  %s830_s5 = inlined_call_operand.vmem [shape: f32[128,128], index: 5, kind: input, shape index: {}]   ;;  %s831_s6 = inlined_call_operand.vmem [shape: f32[1,128], index: 6, kind: input, shape index: {}]   ;;  %s832_s7 = inlined_call_operand.hbm [shape: f32[8,128], index: 7, kind: output, shape index: {}]  }
   0x1   :  { %v28_v0 = vld [vmem:[%s826_s1] sm:$0xff]  ;;  %v29_v1 = vld [vmem:[%s826_s1 + $0x8] sm:$0xff]  ;;  %v30_v2 = vld [vmem:[%s826_s1 + $0x10] sm:$0xff]  ;;  %483 = vmatprep.subr.bf16.mxu0 %v583_v3  ;;  %410 = vmatprep.mubr.msk.f32.mxu0 %vm584_vm0, %v585_v6 }
   0x2   :  { %v484_v4 = vpack.c.bf16 %v29_v1, %v28_v0  ;;  %v31_v5 = vld [vmem:[%s826_s1 + $0x18] sm:$0xff]  ;;  %507 = vmatprep.subr.bf16.mxu1 %v583_v3  ;;  %445 = vmatprep.mubr.msk.f32.mxu1 %vm584_vm0, %v585_v6  ;;  %v32_v8 = vld [vmem:[%s826_s1 + $0x20] sm:$0xff]  ;;  %v33_v9 = vld [vmem:[%s826_s1 + $0x28] sm:$0xff] }
   0x3   :  { %v487_v7 = vpack.c.bf16 %v31_v5, %v30_v2  ;;  %v122_v10 = vld [vmem:[%s828_s3] sm:$0xff]  ;;  %v123_v11 = vld [vmem:[%s828_s3 + $0x8] sm:$0xff]  ;;  %v124_v12 = vld [vmem:[%s828_s3 + $0x10] sm:$0xff]  ;;  %v490_v14 = vpack.c.bf16 %v33_v9, %v32_v8 }
   0x4   :  { %485 = vmatpush3.bf16.msra.mxu0 %v484_v4  ;;  %v125_v13 = vld [vmem:[%s828_s3 + $0x18] sm:$0xff]  ;;  %v508_v15 = vpack.c.bf16 %v123_v11, %v122_v10  ;;  %v34_v16 = vld [vmem:[%s826_s1 + $0x30] sm:$0xff]  ;;  %v126_v19 = vld [vmem:[%s828_s3 + $0x20] sm:$0xff] }
   0x5   :  { %486 = vmatprep.subr.bf16.mxu0 %v583_v3  ;;  %v35_v17 = vld [vmem:[%s826_s1 + $0x38] sm:$0xff]  ;;  %v511_v18 = vpack.c.bf16 %v125_v13, %v124_v12  ;;  %v127_v20 = vld [vmem:[%s828_s3 + $0x28] sm:$0xff] }
   0x6   :  { %509 = vmatpush3.bf16.msra.mxu1 %v508_v15 }
   0x7   :  { %510 = vmatprep.subr.bf16.mxu1 %v583_v3 }
   0x8   :  { %488 = vmatpush3.bf16.msra.mxu0 %v487_v7 }
   0x9   :  { %489 = vmatprep.subr.bf16.mxu0 %v583_v3 }
   0xa   :  { %12 = vsyncpa [#allocation3], 0  ;;  %v493_v21 = vpack.c.bf16 %v35_v17, %v34_v16  ;;  %v36_v22 = vld [vmem:[%s826_s1 + $0x40] sm:$0xff]  ;;  %v37_v23 = vld [vmem:[%s826_s1 + $0x48] sm:$0xff]  ;;  %512 = vmatpush3.bf16.msra.mxu1 %v511_v18  ;;  %v514_v24 = vpack.c.bf16 %v127_v20, %v126_v19  ;;  %s586_s29 = smov [#allocation2]  }
   0xb   :  { %513 = vmatprep.subr.bf16.mxu1 %v583_v3  ;;  %v128_v25 = vld [vmem:[%s828_s3 + $0x30] sm:$0xff]  ;;  %v129_v26 = vld [vmem:[%s828_s3 + $0x38] sm:$0xff]  ;;  %v496_v27 = vpack.c.bf16 %v37_v23, %v36_v22  ;;  %v130_v31 = vld [vmem:[%s828_s3 + $0x40] sm:$0xff]  ;;  %s316_s30 = sshll.u32 %s586_s29, 4  ;;  %s317_s30 = int_to_ptr.vmem [resolvable:$true] %s316_s30 }
   0xc   :  { %491 = vmatpush3.bf16.msra.mxu0 %v490_v14  ;;  %v38_v28 = vld [vmem:[%s826_s1 + $0x50] sm:$0xff]  ;;  %v39_v29 = vld [vmem:[%s826_s1 + $0x58] sm:$0xff]  ;;  %v517_v30 = vpack.c.bf16 %v129_v26, %v128_v25  ;;  %v131_v32 = vld [vmem:[%s828_s3 + $0x48] sm:$0xff]  ;;  %p564_p1 = scmp.lt.s32.totalorder %s317_s30, %s317_s30 }
   0xd   :  { %492 = vmatprep.subr.bf16.mxu0 %v583_v3  ;;  %v499_v33 = vpack.c.bf16 %v39_v29, %v38_v28  ;;  %v40_v34 = vld [vmem:[%s826_s1 + $0x60] sm:$0xff]  ;;  %v41_v35 = vld [vmem:[%s826_s1 + $0x68] sm:$0xff]  ;;  %v520_v36 = vpack.c.bf16 %v131_v32, %v130_v31  ;;  %v132_v37 = vld [vmem:[%s828_s3 + $0x50] sm:$0xff] }
   0xe   :  { %515 = vmatpush3.bf16.msra.mxu1 %v514_v24  ;;  %v133_v38 = vld [vmem:[%s828_s3 + $0x58] sm:$0xff]  ;;  %v502_v39 = vpack.c.bf16 %v41_v35, %v40_v34  ;;  %v42_v40 = vld [vmem:[%s826_s1 + $0x70] sm:$0xff]  ;;  %v134_v43 = vld [vmem:[%s828_s3 + $0x60] sm:$0xff] }
   0xf   :  { %516 = vmatprep.subr.bf16.mxu1 %v583_v3  ;;  %v43_v41 = vld [vmem:[%s826_s1 + $0x78] sm:$0xff]  ;;  %v523_v42 = vpack.c.bf16 %v133_v38, %v132_v37  ;;  %v135_v44 = vld [vmem:[%s828_s3 + $0x68] sm:$0xff]  ;;  %v27_v47 = vld [vmem:[%s825_s0] sm:$0xff] }
  0x10   :  { %494 = vmatpush3.bf16.msra.mxu0 %v493_v21  ;;  %v505_v45 = vpack.c.bf16 %v43_v41, %v42_v40  ;;  %v526_v46 = vpack.c.bf16 %v135_v44, %v134_v43  ;;  %v136_v48 = vld [vmem:[%s828_s3 + $0x70] sm:$0xff]  ;;  %v137_v49 = vld [vmem:[%s828_s3 + $0x78] sm:$0xff]  ;;  %v216_v51 = vld [vmem:[%s830_s5] sm:$0xff] }
  0x11   :  { %495 = vmatprep.subr.bf16.mxu0 %v583_v3  ;;  %v529_v50 = vpack.c.bf16 %v137_v49, %v136_v48  ;;  %v217_v52 = vld [vmem:[%s830_s5 + $0x8] sm:$0xff]  ;;  %v218_v53 = vld [vmem:[%s830_s5 + $0x10] sm:$0xff]  ;;  %v219_v55 = vld [vmem:[%s830_s5 + $0x18] sm:$0xff] }
  0x12   :  { %518 = vmatpush3.bf16.msra.mxu1 %v517_v30  ;;  %v532_v54 = vpack.c.bf16 %v217_v52, %v216_v51  ;;  %v535_v56 = vpack.c.bf16 %v219_v55, %v218_v53  ;;  %v220_v57 = vld [vmem:[%s830_s5 + $0x20] sm:$0xff]  ;;  %v221_v58 = vld [vmem:[%s830_s5 + $0x28] sm:$0xff]  ;;  %v222_v60 = vld [vmem:[%s830_s5 + $0x30] sm:$0xff] }
  0x13   :  { %519 = vmatprep.subr.bf16.mxu1 %v583_v3  ;;  %v538_v59 = vpack.c.bf16 %v221_v58, %v220_v57  ;;  %v223_v61 = vld [vmem:[%s830_s5 + $0x38] sm:$0xff]  ;;  %v224_v63 = vld [vmem:[%s830_s5 + $0x40] sm:$0xff]  ;;  %v225_v0 = vld [vmem:[%s830_s5 + $0x48] sm:$0xff] }
  0x14   :  { %497 = vmatpush3.bf16.msra.mxu0 %v496_v27  ;;  %v541_v62 = vpack.c.bf16 %v223_v61, %v222_v60  ;;  %v544_v1 = vpack.c.bf16 %v225_v0, %v224_v63  ;;  %v226_v2 = vld [vmem:[%s830_s5 + $0x50] sm:$0xff]  ;;  %v227_v4 = vld [vmem:[%s830_s5 + $0x58] sm:$0xff]  ;;  %v229_v7 = vld [vmem:[%s830_s5 + $0x68] sm:$0xff] }
  0x15   :  { %498 = vmatprep.subr.bf16.mxu0 %v583_v3  ;;  %v547_v5 = vpack.c.bf16 %v227_v4, %v226_v2  ;;  %v324_v9 = vld [vmem:[%s827_s2] ss:$0 sm:$0xff]  ;;  %v230_v14 = vld [vmem:[%s830_s5 + $0x70] sm:$0xff]  ;;  %v231_v15 = vld [vmem:[%s830_s5 + $0x78] sm:$0xff] }
  0x16   :  { %521 = vmatpush3.bf16.msra.mxu1 %v520_v36  ;;  %v553_v16 = vpack.c.bf16 %v231_v15, %v230_v14  ;;  %v326_v21 = vld [vmem:[%s831_s6] ss:$0 sm:$0xff] }
  0x17   :  { %522 = vmatprep.subr.bf16.mxu1 %v583_v3 }
  0x18   :  { %500 = vmatpush3.bf16.msra.mxu0 %v499_v33 }
  0x19   :  { %501 = vmatprep.subr.bf16.mxu0 %v583_v3 }
  0x1a   :  { %524 = vmatpush3.bf16.msra.mxu1 %v523_v42 }
  0x1b   :  { %525 = vmatprep.subr.bf16.mxu1 %v583_v3 }
  0x1c   :  { %503 = vmatpush3.bf16.msra.mxu0 %v502_v39 }
  0x1d   :  { %504 = vmatprep.subr.bf16.mxu0 %v583_v3 }
  0x1e   :  { %527 = vmatpush3.bf16.msra.mxu1 %v526_v46 }
  0x1f   :  { %528 = vmatprep.subr.bf16.mxu1 %v583_v3 }
  0x20   :  { %506 = vmatpush3.bf16.msra.mxu0 %v505_v45 }
  0x21   :  { %531 = vmatprep.subr.bf16.mxu0 %v583_v3 }
  0x22   :  { %530 = vmatpush3.bf16.msra.mxu1 %v529_v50 }
  0x23   :  { %411 = vmatmul.mubr.f32.vlgmr.msra.gmra.mrb[0].mxu0 %v27_v47 }
  0x24   :  { %480 = vmatprep.mubr.msk.f32.mxu0 %vm584_vm0, %v585_v6  ;;  %533 = vmatpush3.bf16.msra.mxu0 %v532_v54  ;;  %v228_v6 = vld [vmem:[%s830_s5 + $0x60] sm:$0xff]  ;;  %s559_s5 = scalar_lea.vmem %s317_s30, 128 }
  0x25   :  { %534 = vmatprep.subr.bf16.mxu0 %v583_v3  ;;  %v550_v8 = vpack.c.bf16 %v229_v7, %v228_v6  ;;  %p560_p0 = scmp.ne.s32.totalorder %s317_s30, %s559_s5  ;;  %p565_p2 = scmp.lt.s32.totalorder %s559_s5, %s559_s5 }
  0x27   :  { %p566_p3 = por %p565_p2, %p564_p1 }
  0x28   :  { %536 = vmatpush3.bf16.msra.mxu0 %v535_v56 }
  0x29   :  { %537 = vmatprep.subr.bf16.mxu0 %v583_v3  ;;  %p567_p4 = pnand %p566_p3, %p560_p0 }
  0x2c   :  { %539 = vmatpush3.bf16.msra.mxu0 %v538_v59 }
  0x2d   :  { %540 = vmatprep.subr.bf16.mxu0 %v583_v3 }
  0x30   :  { %542 = vmatpush3.bf16.msra.mxu0 %v541_v62 }
  0x31   :  { %543 = vmatprep.subr.bf16.mxu0 %v583_v3 }
  0x34   :  { %545 = vmatpush3.bf16.msra.mxu0 %v544_v1 }
  0x35   :  { %546 = vmatprep.subr.bf16.mxu0 %v583_v3 }
  0x38   :  { %548 = vmatpush3.bf16.msra.mxu0 %v547_v5 }
  0x39   :  { %549 = vmatprep.subr.bf16.mxu0 %v583_v3 }
  0x3c   :  { %551 = vmatpush3.bf16.msra.mxu0 %v550_v8 }
  0x3d   :  { %552 = vmatprep.subr.bf16.mxu0 %v583_v3  ;;  %v325_v3 = vld [vmem:[%s829_s4] ss:$0 sm:$0xff] }
  0x40   :  { %554 = vmatpush3.bf16.msra.mxu0 %v553_v16 }
  0xf6   :  { %v117_v10 = vpop.f32.mrb[0].mxu0 }
  0xf7   :  { %v118_v11 = vadd.f32 %v324_v9, %v117_v10  ;;  %v412_v12 = vpop.f32.mrb[1].mxu0 }
  0xf9   :  { %v121_v13 = vmax.f32 %v118_v11, 0.0 }
  0xfb   :  { %446 = vmatmul.mubr.f32.vlgmr.msra.gmra.mrb[0].mxu1 %v121_v13 }
 0x1ce   :  { %v211_v17 = vpop.f32.mrb[0].mxu1 }
 0x1cf   :  { %v212_v18 = vadd.f32 %v325_v3, %v211_v17  ;;  %v447_v19 = vpop.f32.mrb[1].mxu1 }
 0x1d1   :  { %v215_v20 = vmax.f32 %v212_v18, 0.0 }
 0x1d3   :  { %481 = vmatmul.mubr.f32.vlgmr.msra.gmra.mrb[2].mxu0 %v215_v20 }
 0x2a6   :  { %v305_v22 = vpop.f32.mrb[2].mxu0 }
 0x2a7   :  { %v306_v23 = vadd.f32 %v326_v21, %v305_v22  ;;  %v482_v24 = vpop.f32.mrb[3].mxu0 }
 0x2a9   :  { %309 = vst [vmem:[#allocation2] sm:$0xff] %v306_v23 }
 0x2aa   :  { %570 = shalt.err (!%p567_p4)
}
 0x2ab   :  { %s571_s9 = scalar_lea.hbm %s832_s7, 128 }
 0x2ac   :  { %p572_p5 = scmp.ne.s32.totalorder %s832_s7, %s571_s9  ;;  %p575_p6 = scmp.lt.u32.totalorder %s571_s9, %s832_s7 }
 0x2ae   :  { %p577_p7 = pnand %p575_p6, %p572_p5 }
 0x2b0   :  { %580 = shalt.err (!%p577_p7)
}
 0x2b1   :  { %319 = dma.vmem_to_hbm [thread:$0]  %s317_s30, 128, %s832_s7, [#allocation3]  }
 0x2b2   :  { %581 = dma.done.wait [#allocation3], 128  }
 0x2b3   :  { %582 = vsyncadd [#allocation3], 4294967168 }
 0x2b4   :  { %323 = vsyncpa [#allocation3], 1 }

</bundles_post_ra>
